<compile_context>
chip_gen: v5e
topology: v5e:2x2
jax: 0.10.0
libtpu: 0.0.40
codegen_flags: <defaults>
</compile_context>

<pallas_src>
import jax
import jax.numpy as jnp
from jax.experimental import pallas as pl
from jax.experimental.pallas import tpu as pltpu


def _round_up(x, m):
    return (x + m - 1) // m * m


def _sigmoid(x):
    # EUP-friendly sigmoid: single transcendental, no f32 divide.
    return 0.5 * jnp.tanh(0.5 * x) + 0.5


def _g_gauss_kernel(zc_ref, u_ref, a_ref, out_ref):
    u = u_ref[...].astype(jnp.float32)     # (TB, TN)
    zc = zc_ref[...].astype(jnp.float32)   # (TB, TN)
    a = a_ref[...].astype(jnp.float32)     # (10, TN)

    # Keep params 2-D (1, TN): broadcasts over the batch sublanes directly.
    a1, a2, a3, a4, a5 = a[0:1], a[1:2], a[2:3], a[3:4], a[4:5]
    a6, a7, a8, a9, a10 = a[5:6], a[6:7], a[7:8], a[8:9], a[9:10]

    mu = a1 * _sigmoid(a2 * u + a3) + a4 * u + a5
    v = a6 * _sigmoid(a7 * u + a8) + a9 * u + a10
    out_ref[...] = ((zc - mu) * v + mu).astype(out_ref.dtype)


def g_gauss(z_c, u, params, *, tile_batch=None, tile_feat=None):
    """Ladder-network G_gauss.

    z_c, u : (batch, size) activations (f32 or bf16; compute is f32 inside).
    params : (10, size) stacked [a1..a10] (any float dtype).
    """
    assert z_c.shape == u.shape, (z_c.shape, u.shape)
    B, N = z_c.shape
    assert params.shape == (10, N), params.shape

    act_itemsize = jnp.dtype(z_c.dtype).itemsize
    par_itemsize = jnp.dtype(params.dtype).itemsize
    # Sublane packing: f32 -> 8 rows/vreg, bf16 -> 16, int8/fp8 -> 32.
    sub = {4: 8, 2: 16, 1: 32}.get(act_itemsize, 8)

    # --- Feature tile: lane multiple of 128; no array padding (ragged tail
    #     blocks are masked by Pallas). ------------------------------------
    if tile_feat is None:
        tn = min(2048, _round_up(N, 128))
    else:
        tn = tile_feat
    assert tn == N or tn % 128 == 0, tn

    # --- Batch tile: ~2 MiB activation block, multiple of the sublane
    #     packing, capped so the batch axis splits into >=2 blocks when it
    #     can (keeps both v7x TensorCores fed). ----------------------------
    if tile_batch is None:
        target_bytes = 2 << 20
        tb = max(sub, (target_bytes // (tn * act_itemsize)) // sub * sub)
        tb = min(tb, _round_up(B, sub))
        if B > sub:
            tb = min(tb, _round_up(pl.cdiv(B, 2), sub))
    else:
        tb = tile_batch
    assert tb == B or tb % sub == 0, (tb, sub)

    nb = pl.cdiv(B, tb)
    nf = pl.cdiv(N, tn)
    # If the whole problem would be a single block, split the feature axis so
    # a dual-TensorCore chip still gets two parallel blocks.
    if nb == 1 and nf == 1 and tn > 128 and N > 128:
        tn = 128 * max(1, pl.cdiv(N, 2 * 128))
        nf = pl.cdiv(N, tn)

    # Batch innermost (fastest): params block index (0, j) is constant across
    # consecutive grid steps, so its (10, tn) tile is fetched once per
    # feature column instead of once per step.
    grid = (nf, nb)
    act_spec = pl.BlockSpec((tb, tn), lambda j, i: (i, j))
    par_spec = pl.BlockSpec((10, tn), lambda j, i: (0, j))

    # Scoped-VMEM budget derived from the actual tiles (3 activation arrays,
    # double-buffered, plus params) with 1.5x headroom; clamped well under
    # v7x's 64 MiB physical VMEM and at least the 16 MiB v5e scoped default.
    block_bytes = tb * tn * act_itemsize
    vmem_bytes = 2 * (3 * block_bytes + 10 * tn * par_itemsize)
    vmem_limit = int(min(56 << 20, max(16 << 20, vmem_bytes * 3 // 2 + (2 << 20))))

    cost = pl.CostEstimate(
        flops=21 * B * N,
        transcendentals=2 * B * N,
        bytes_accessed=3 * B * N * act_itemsize + 10 * N * par_itemsize,
    )

    return pl.pallas_call(
        _g_gauss_kernel,
        out_shape=jax.ShapeDtypeStruct((B, N), z_c.dtype),
        grid_spec=pltpu.PrefetchScalarGridSpec(
            num_scalar_prefetch=0,
            grid=grid,
            in_specs=[act_spec, act_spec, par_spec],
            out_specs=act_spec,
        ),
        compiler_params=pltpu.CompilerParams(
            dimension_semantics=("parallel", "parallel"),
            vmem_limit_bytes=vmem_limit,
        ),
        cost_estimate=cost,
    )(z_c, u, params)


def g_gauss_ref(z_c, u, params):
    a = [params[i] for i in range(10)]
    mu = a[0] * jax.nn.sigmoid(a[1] * u + a[2]) + a[3] * u + a[4]
    v = a[5] * jax.nn.sigmoid(a[6] * u + a[7]) + a[8] * u + a[9]
    return (z_c - mu) * v + mu


if __name__ == "__main__":
    key = jax.random.PRNGKey(0)
    k_zc, k_u, k_p = jax.random.split(key, 3)

    # Ragged ladder-network-like shapes: exercises masked tail blocks on both
    # the batch and feature axes (no wrapper padding anywhere).
    batch, size = 12, 250
    z_c = jax.random.normal(k_zc, (batch, size), dtype=jnp.float32)
    u = jax.random.normal(k_u, (batch, size), dtype=jnp.float32)

    # Module init is a2 = a7 = 1, rest 0; add a small deterministic
    # perturbation so the computation is non-degenerate.
    base = jnp.zeros((10, size), jnp.float32).at[1].set(1.0).at[6].set(1.0)
    params = base + 0.1 * jax.random.normal(k_p, (10, size), dtype=jnp.float32)

    out = jax.block_until_ready(g_gauss(z_c, u, params))
    ref = g_gauss_ref(z_c, u, params)
    assert out.shape == (batch, size)
    assert out.dtype == z_c.dtype
    assert jnp.allclose(out, ref, atol=1e-5, rtol=1e-5)

    # bf16 I/O path (halves HBM bytes): batch tile becomes a multiple of 16.
    b2, s2 = 16, 256
    z2 = jax.random.normal(k_zc, (b2, s2), dtype=jnp.float32)
    u2 = jax.random.normal(k_u, (b2, s2), dtype=jnp.float32)
    p2 = (jnp.zeros((10, s2), jnp.float32).at[1].set(1.0).at[6].set(1.0)
          + 0.1 * jax.random.normal(k_p, (10, s2), dtype=jnp.float32))
    z2b = z2.astype(jnp.bfloat16)
    u2b = u2.astype(jnp.bfloat16)
    out2 = jax.block_until_ready(g_gauss(z2b, u2b, p2))
    ref2 = g_gauss_ref(z2b.astype(jnp.float32), u2b.astype(jnp.float32), p2)
    assert out2.dtype == jnp.bfloat16
    assert jnp.allclose(out2.astype(jnp.float32), ref2, atol=3e-2, rtol=3e-2)

    print("KERNEL_OK")
</pallas_src>

<mosaic_0001>
module attributes {stable_mosaic.version = 11 : i64} {
  func.func @_g_gauss_kernel(%arg0: i32, %arg1: i32, %arg2: memref<8x256xf32, #tpu.memory_space<vmem>>, %arg3: memref<8x256xf32, #tpu.memory_space<vmem>>, %arg4: memref<10x256xf32, #tpu.memory_space<vmem>>, %arg5: memref<8x256xf32, #tpu.memory_space<vmem>>) attributes {dimension_semantics = [#tpu.dimension_semantics<parallel>, #tpu.dimension_semantics<parallel>], iteration_bounds = array<i64: 1, 2>, scalar_prefetch = 0 : i64, scratch_operands = 0 : i64, tpu.core_type = #tpu.core_type<tc>, window_params = [{transform_indices = @transform_0, window_bounds = array<i64: 8, 256>}, {transform_indices = @transform_1, window_bounds = array<i64: 8, 256>}, {transform_indices = @transform_2, window_bounds = array<i64: 10, 256>}, {transform_indices = @transform_3, window_bounds = array<i64: 8, 256>}]} {
    %c0 = arith.constant 0 : index
    %c0_0 = arith.constant 0 : index
    %0 = vector.load %arg3[%c0, %c0_0] : memref<8x256xf32, #tpu.memory_space<vmem>>, vector<8x256xf32>
    %c0_1 = arith.constant 0 : index
    %c0_2 = arith.constant 0 : index
    %1 = vector.load %arg2[%c0_1, %c0_2] : memref<8x256xf32, #tpu.memory_space<vmem>>, vector<8x256xf32>
    %c0_3 = arith.constant 0 : index
    %c0_4 = arith.constant 0 : index
    %2 = vector.load %arg4[%c0_3, %c0_4] : memref<10x256xf32, #tpu.memory_space<vmem>>, vector<10x256xf32>
    %3 = vector.extract_strided_slice %2 {offsets = [0, 0], sizes = [1, 256], strides = [1, 1]} : vector<10x256xf32> to vector<1x256xf32>
    %4 = vector.extract_strided_slice %2 {offsets = [1, 0], sizes = [1, 256], strides = [1, 1]} : vector<10x256xf32> to vector<1x256xf32>
    %5 = vector.extract_strided_slice %2 {offsets = [2, 0], sizes = [1, 256], strides = [1, 1]} : vector<10x256xf32> to vector<1x256xf32>
    %6 = vector.extract_strided_slice %2 {offsets = [3, 0], sizes = [1, 256], strides = [1, 1]} : vector<10x256xf32> to vector<1x256xf32>
    %7 = vector.extract_strided_slice %2 {offsets = [4, 0], sizes = [1, 256], strides = [1, 1]} : vector<10x256xf32> to vector<1x256xf32>
    %8 = vector.extract_strided_slice %2 {offsets = [5, 0], sizes = [1, 256], strides = [1, 1]} : vector<10x256xf32> to vector<1x256xf32>
    %9 = vector.extract_strided_slice %2 {offsets = [6, 0], sizes = [1, 256], strides = [1, 1]} : vector<10x256xf32> to vector<1x256xf32>
    %10 = vector.extract_strided_slice %2 {offsets = [7, 0], sizes = [1, 256], strides = [1, 1]} : vector<10x256xf32> to vector<1x256xf32>
    %11 = vector.extract_strided_slice %2 {offsets = [8, 0], sizes = [1, 256], strides = [1, 1]} : vector<10x256xf32> to vector<1x256xf32>
    %12 = vector.extract_strided_slice %2 {offsets = [9, 0], sizes = [1, 256], strides = [1, 1]} : vector<10x256xf32> to vector<1x256xf32>
    %13 = vector.broadcast %4 : vector<1x256xf32> to vector<8x256xf32>
    %14 = arith.mulf %13, %0 : vector<8x256xf32>
    %15 = vector.broadcast %5 : vector<1x256xf32> to vector<8x256xf32>
    %16 = arith.addf %14, %15 : vector<8x256xf32>
    %cst = arith.constant 5.000000e-01 : f32
    %17 = vector.broadcast %cst : f32 to vector<8x256xf32>
    %18 = arith.mulf %17, %16 : vector<8x256xf32>
    %19 = math.tanh %18 : vector<8x256xf32>
    %cst_5 = arith.constant 5.000000e-01 : f32
    %20 = vector.broadcast %cst_5 : f32 to vector<8x256xf32>
    %21 = arith.mulf %20, %19 : vector<8x256xf32>
    %cst_6 = arith.constant 5.000000e-01 : f32
    %22 = vector.broadcast %cst_6 : f32 to vector<8x256xf32>
    %23 = arith.addf %21, %22 : vector<8x256xf32>
    %24 = vector.broadcast %3 : vector<1x256xf32> to vector<8x256xf32>
    %25 = arith.mulf %24, %23 : vector<8x256xf32>
    %26 = vector.broadcast %6 : vector<1x256xf32> to vector<8x256xf32>
    %27 = arith.mulf %26, %0 : vector<8x256xf32>
    %28 = arith.addf %25, %27 : vector<8x256xf32>
    %29 = vector.broadcast %7 : vector<1x256xf32> to vector<8x256xf32>
    %30 = arith.addf %28, %29 : vector<8x256xf32>
    %31 = vector.broadcast %9 : vector<1x256xf32> to vector<8x256xf32>
    %32 = arith.mulf %31, %0 : vector<8x256xf32>
    %33 = vector.broadcast %10 : vector<1x256xf32> to vector<8x256xf32>
    %34 = arith.addf %32, %33 : vector<8x256xf32>
    %cst_7 = arith.constant 5.000000e-01 : f32
    %35 = vector.broadcast %cst_7 : f32 to vector<8x256xf32>
    %36 = arith.mulf %35, %34 : vector<8x256xf32>
    %37 = math.tanh %36 : vector<8x256xf32>
    %cst_8 = arith.constant 5.000000e-01 : f32
    %38 = vector.broadcast %cst_8 : f32 to vector<8x256xf32>
    %39 = arith.mulf %38, %37 : vector<8x256xf32>
    %cst_9 = arith.constant 5.000000e-01 : f32
    %40 = vector.broadcast %cst_9 : f32 to vector<8x256xf32>
    %41 = arith.addf %39, %40 : vector<8x256xf32>
    %42 = vector.broadcast %8 : vector<1x256xf32> to vector<8x256xf32>
    %43 = arith.mulf %42, %41 : vector<8x256xf32>
    %44 = vector.broadcast %11 : vector<1x256xf32> to vector<8x256xf32>
    %45 = arith.mulf %44, %0 : vector<8x256xf32>
    %46 = arith.addf %43, %45 : vector<8x256xf32>
    %47 = vector.broadcast %12 : vector<1x256xf32> to vector<8x256xf32>
    %48 = arith.addf %46, %47 : vector<8x256xf32>
    %49 = arith.subf %1, %30 : vector<8x256xf32>
    %50 = arith.mulf %49, %48 : vector<8x256xf32>
    %51 = arith.addf %50, %30 : vector<8x256xf32>
    %c0_10 = arith.constant 0 : index
    %c0_11 = arith.constant 0 : index
    %52 = vector.load %arg5[%c0_10, %c0_11] : memref<8x256xf32, #tpu.memory_space<vmem>>, vector<8x256xf32>
    tpu.vector_store %arg5[%c0_10, %c0_11], %51 {strides = array<i32>} : memref<8x256xf32, #tpu.memory_space<vmem>>, vector<8x256xf32>,
    return
  }
  func.func @transform_0(%arg0: i32, %arg1: i32) -> (i32, i32) {
    %c0_i32 = arith.constant 0 : i32
    return %arg1, %arg0 : i32, i32
  }
  func.func @transform_1(%arg0: i32, %arg1: i32) -> (i32, i32) {
    %c0_i32 = arith.constant 0 : i32
    return %arg1, %arg0 : i32, i32
  }
  func.func @transform_2(%arg0: i32, %arg1: i32) -> (i32, i32) {
    %c0_i32 = arith.constant 0 : i32
    %c0_i32_0 = arith.constant 0 : i32
    return %c0_i32, %arg0 : i32, i32
  }
  func.func @transform_3(%arg0: i32, %arg1: i32) -> (i32, i32) {
    %c0_i32 = arith.constant 0 : i32
    return %arg1, %arg0 : i32, i32
  }
}

</mosaic_0001>

<bundles_post_ra>
// kernel: tpu_custom_call.1
= control target key start
LH: loop header
LB: loop body
LE: loop exit
PB: predicated region body
PF: predicated region fallthrough
CT: control target
= control target key end

     0   :  { %s993_s0 = inlined_call_operand.hbm [shape: f32[12,250], index: 0, kind: input, shape index: {}]   ;;  %s994_s1 = inlined_call_operand.hbm [shape: f32[12,250], index: 1, kind: input, shape index: {}]   ;;  %s995_s2 = inlined_call_operand.hbm [shape: f32[10,250], index: 2, kind: input, shape index: {}]   ;;  %s996_s3 = inlined_call_operand.hbm [shape: f32[12,250], index: 3, kind: output, shape index: {}]  }
   0x1   :  { %999 = sst [smem:[#allocation16_spill]] %s995_s2 }
   0x2   :  { %8 = vsyncpa [#allocation3], 0 }
   0x3   :  { %10 = vsyncpa [#allocation3 + $0x1], 0 }
   0x4   :  { %11 = vsyncpa [#allocation6], 0 }
   0x5   :  { %13 = vsyncpa [#allocation6 + $0x1], 0 }
   0x6   :  { %14 = vsyncpa [#allocation4], 0 }
   0x7   :  { %16 = vsyncpa [#allocation4 + $0x1], 0  ;;  %s812_s12 = smov 0   ;;  %s814_s13 = smov 0  }
   0x8   :  { %s816_s14 = smov 0   ;;  %s818_s15 = smov 0  }
   0x9   :  { %s820_s16 = smov 0   ;;  %s822_s17 = smov 0  }
   0xa LB: > { %1000 = sst [smem:[#allocation13_spill]] %s783_s16  ;;  %s843_s18 = sadd.s32 4294967295, %s787_s17   ;;  %s787_s17 = sphi %s822_s17, %s22_s17   ;;  %s783_s16 = sphi %s820_s16, %s1011_s16   ;;  %s779_s15 = sphi %s818_s15, %s1010_s15   ;;  %s775_s14 = sphi %s816_s14, %s1014_s14   ;;  %s771_s13 = sphi %s814_s13, %s1013_s13   ;;  %s767_s12 = sphi %s812_s12, %s1012_s12  }
   0xb   : > { %p497_p0 = scmp.ge.s32.totalorder %s787_s17, 1  ;;  %p57_p1 = scmp.eq.s32.totalorder %s843_s18, 0 }
   0xc   : > { %p149_p2 = scmp.lt.s32.totalorder %s787_s17, 3  ;;  %s1001_s2 = sld [smem:[#allocation16_spill]] }
   0xd   : > { %s789_s23 = smov [#allocation7]   ;;  %p499_p6 = scmp.ge.s32.totalorder %s787_s17, 2 }
   0xe   : > { %p851_p3 = pnand %p497_p0, %p149_p2  ;;  %s165_s24 = sshll.u32 %s789_s23, 4  ;;  %s166_s24 = int_to_ptr.vmem [resolvable:$true] %s165_s24 }
   0xf   : > { %s790_s25 = smov 256   ;;  %s791_s26 = smov 16  }
  0x10   : > { %p529_p4 = pneg %p851_p3  ;;  %s496_s27 = sadd.s32 4294967294, %s787_s17  }
  0x11   : > { %s31_s28 = sadd.s32 1, %s783_s16  ;;  %s43_s29 = sadd.s32 1, %s775_s14 }
  0x12   : > { %s163_s21 = sshll.u32 %s1001_s2, 4  ;;  %p530_p5 = pnand %p529_p4, %p57_p1  ;;  %s164_s21 = int_to_ptr.hbm [resolvable:$true] %s163_s21 }
  0x13   : > { %p32_p7 = scmp.ge.s32.totalorder %s31_s28, 2  ;;  %p50_p8 = scmp.ne.s32.totalorder %s775_s14, %s771_s13 }
  0x14   : > { %532 = dma.hbm_to_vmem [thread:$0]  (!%p530_p5), %s164_s21, 512, %s166_s24, [#allocation6], %s790_s25, %s790_s25, %s791_s26  }
  0x15   : > { %p51_p9 = scmp.eq.s32.totalorder %s787_s17, 0  ;;  %p56_p10 = scmp.ne.s32.totalorder %s771_s13, %s767_s12 }
  0x16   : > { %s1016_s28 = smov (%p32_p7, %s31_s28), 0  ;;  %p136_p13 = scmp.eq.s32.totalorder %s843_s18, 1 }
  0x17   : > { %1003 = sst [smem:[#allocation14_spill]] %s1016_s28  ;;  %p870_p11 = por %p51_p9, %p50_p8 }
  0x18   : > { %p876_p12 = por %p57_p1, %p56_p10  ;;  %s38_s5 = ssub.s32 %s783_s16, %s1016_s28 }
  0x19   : > { %p41_p0 = scmp.eq.s32.totalorder %s38_s5, 0  ;;  %p142_p2 = scmp.eq.s32.totalorder %s496_s27, 1 }
  0x1a   : > { %p883_p4 = por %p136_p13, %p50_p8  ;;  %p545_p5 = scmp.lt.s32.totalorder %s787_s17, 2 }
  0x1b   : > { %s889_s7 = scalar_select %p41_p0, %s775_s14, %s43_s29  }
  0x1c   : > { %p891_p7 = por %p142_p2, %p56_p10  ;;  %s179_s9 = sand.u32 1, %s775_s14  }
  0x1d   : > { %1007 = sst [smem:[#allocation15_spill]] %s889_s7  ;;  %s500_s10 = sshll.u32 %s179_s9, 4 }
  0x1e   : > { %s516_s11 = sshll.u32 %s783_s16, 4  ;;  %s183_s23 = scalar_lea.vmem [#allocation2], %s500_s10 }
  0x1f   : > { %s190_s21 = scalar_lea.hbm %s993_s0, %s516_s11  ;;  %s194_s24 = sshll.u32 %s183_s23, 4  ;;  %s195_s24 = int_to_ptr.vmem [resolvable:$true] %s194_s24 }
  0x20   : > { %s192_s25 = sshll.u32 %s190_s21, 4  ;;  %p534_p8 = pnand %p545_p5, %p870_p11  ;;  %s193_s25 = int_to_ptr.hbm [resolvable:$true] %s192_s25 }
  0x21   : > { %s212_s29 = scalar_lea.hbm %s994_s1, %s516_s11  ;;  %s201_s5 = sand.u32 1, %s787_s17  }
  0x22   : > { %s180_s2 = scalar_lea.sflag [#allocation3], %s179_s9  ;;  %s214_s28 = sshll.u32 %s212_s29, 4  ;;  %s215_s28 = int_to_ptr.hbm [resolvable:$true] %s214_s28 }
  0x23   : > { %536 = dma.hbm_to_vmem [thread:$0]  (!%p534_p8), %s193_s25, 256, %s195_s24, %s180_s2  }
  0x24   : > { %s205_s16 = scalar_lea.vmem [#allocation5], %s500_s10  ;;  %s202_s19 = scalar_lea.sflag [#allocation6], %s201_s5 }
  0x25   : > { %s216_s7 = sshll.u32 %s205_s16, 4  ;;  %225 = sbr.rel (%p851_p3) target bundleno = 86 (0x56), region = 32  ;;  %s217_s7 = int_to_ptr.vmem [resolvable:$true] %s216_s7 }
  0x26   : > { %539 = dma.hbm_to_vmem [thread:$0]  (!%p534_p8), %s215_s28, 256, %s217_s7, %s202_s19  }
  0x27   : > { %s909_s30 = sand.u32 (!%p851_p3), 1, %s771_s13  }
  0x28   : > { %s912_s11 = sshll.u32 (!%p851_p3), %s909_s30, 4  ;;  %s228_s2 = scalar_lea.sflag (!%p851_p3), [#allocation3], %s909_s30 }
  0x29   : > { %s231_s9 = scalar_lea.vmem (!%p851_p3), [#allocation2], %s912_s11 }
  0x2a   : > { %750 = dma.done.wait (%p876_p12), %s228_s2, 256  }
  0x2b   : > { %752 = vsyncadd (%p876_p12), %s228_s2, 4294967040  ;;  %s237_s16 = sand.u32 1, %s843_s18   ;;  %s241_s28 = scalar_lea.vmem [#allocation5], %s912_s11 }
  0x2c   : > { %s238_s22 = scalar_lea.sflag [#allocation6], %s237_s16 }
  0x2d   : > { %754 = dma.done.wait (%p876_p12), %s238_s22, 256  }
  0x2e   : > { %756 = vsyncadd (%p876_p12), %s238_s22, 4294967040 }
  0x2f   : > { %758 = dma.done.wait (%p57_p1), [#allocation6], 512  }
  0x30   : > { %760 = vsyncadd (%p57_p1), [#allocation6], 4294966784  ;;  %v279_v0 = vld [vmem:[%s241_s28] sm:$0xff]  ;;  %v280_v7 = vld [vmem:[%s241_s28 + $0x8] sm:$0xff]  ;;  %s518_s18 = sshll.u32 %s779_s15, 4  ;;  %s274_s15 = scalar_lea.vmem [#allocation8], %s912_s11 }
  0x31   : > { %v930_v1 = vld [vmem:[#allocation7] sm:$0xff]  ;;  %v936_v8 = vld [vmem:[#allocation7 + $0x8] sm:$0xff]  ;;  %v285_v23 = vld [vmem:[#allocation7 + $0x10] sm:$0x3]  ;;  %s369_s10 = scalar_lea.hbm %s996_s3, %s518_s18  ;;  %s371_s20 = sshll.u32 %s274_s15, 4  ;;  %s372_s20 = int_to_ptr.vmem [resolvable:$true] %s371_s20 }
  0x32   : > { %v287_v2 = vperm.slane %v930_v1, 1  ;;  %v291_v3 = vperm.slane %v930_v1, 2  ;;  %v317_v4 = vperm.slane %v930_v1, 6  ;;  %v321_v5 = vperm.slane %v930_v1, 7  ;;  %v286_v31 = vld [vmem:[#allocation7 + $0x18] sm:$0x3] }
  0x33   : > { %v288_v10 = vperm.slane %v936_v8, 1  ;;  %v292_v11 = vperm.slane %v936_v8, 2  ;;  %v318_v15 = vperm.slane %v936_v8, 6  ;;  %v322_v16 = vperm.slane %v936_v8, 7  ;;  %v281_v54 = vld [vmem:[%s231_s9] sm:$0xff]  ;;  %s373_s21 = sshll.u32 %s369_s10, 4  ;;  %s374_s21 = int_to_ptr.hbm [resolvable:$true] %s373_s21 }
  0x34   : > { %v289_v6 = vmul.f32 %v287_v2, %v279_v0  ;;  %v319_v9 = vmul.f32 %v317_v4, %v279_v0  ;;  %v307_v25 = vperm.slane %v930_v1, 3  ;;  %v337_v27 = vperm.slane %v285_v23, 0  ;;  %s356_s23 = scalar_lea.sflag [#allocation4], %s909_s30  ;;  %s711_s24 = sshra.s32 %s374_s21, 4  ;;  %s712_s24 = int_to_ptr.hbm [resolvable:$true] %s711_s24 }
  0x35   : > { %v290_v14 = vmul.f32 %v288_v10, %v280_v7  ;;  %v320_v20 = vmul.f32 %v318_v15, %v280_v7  ;;  %v303_v30 = vperm.slane %v930_v1, 0  ;;  %v308_v32 = vperm.slane %v936_v8, 3  ;;  %s713_s25 = scalar_lea.hbm %s712_s24, 16  ;;  %s717_s29 = scalar_lea.hbm %s996_s3, 32 }
  0x36   : > { %v293_v12 = vadd.f32 %v291_v3, %v289_v6  ;;  %v323_v13 = vadd.f32 %v321_v5, %v319_v9  ;;  %v333_v34 = vperm.slane %v930_v1, 5  ;;  %v309_v37 = vmul.f32 %v307_v25, %v279_v0  ;;  %p714_p1 = scmp.ne.s32.totalorder %s712_s24, %s713_s25  ;;  %p718_p10 = scmp.lt.s32.totalorder %s712_s24, %s996_s3 }
  0x37   : > { %v294_v19 = vadd.f32 %v292_v11, %v290_v14  ;;  %v324_v22 = vadd.f32 %v322_v16, %v320_v20  ;;  %v304_v38 = vperm.slane %v936_v8, 0  ;;  %v339_v40 = vmul.f32 %v337_v27, %v279_v0  ;;  %p719_p11 = scmp.lt.s32.totalorder %s717_s29, %s713_s25 }
  0x38   : > { %v295_v17 = vmul.f32 0.5, %v293_v12  ;;  %v325_v18 = vmul.f32 0.5, %v323_v13  ;;  %v338_v42 = vperm.slane %v286_v31, 0  ;;  %v313_v45 = vperm.slane %v930_v1, 4  ;;  %v282_v1 = vld [vmem:[%s231_s9 + $0x8] sm:$0xff]  ;;  %p715_p3 = pnand %p714_p1, %p883_p4 }
  0x39   : > { %v296_v21 = vmul.f32 0.5, %v294_v19  ;;  %v326_v24 = vmul.f32 0.5, %v324_v22  ;;  %v343_v46 = vperm.slane %v285_v23, 1  ;;  %v310_v47 = vmul.f32 %v308_v32, %v280_v7  ;;  %p720_p12 = por %p719_p11, %p718_p10 }
  0x3a   : > { %599 = vtanh.f32 %v295_v17  ;;  %v334_v51 = vperm.slane %v936_v8, 5  ;;  %v314_v53 = vperm.slane %v936_v8, 4  ;;  %v340_v58 = vmul.f32 %v338_v42, %v280_v7  ;;  %p716_p9 = pneg %p715_p3 }
  0x3b   : > { %601 = vtanh.f32 %v325_v18  ;;  %v344_v63 = vperm.slane %v286_v31, 1 }
  0x3c   : > { %603 = vtanh.f32 %v296_v21  ;;  %p721_p13 = pnand %p720_p12, %p716_p9 }
  0x3d   : > { %605 = vtanh.f32 %v326_v24 }
  0x40   : > { %v600_v26 = vpop.eup %599 }
  0x41   : > { %v602_v28 = vpop.eup %601  ;;  %v299_v29 = vmul.f32 0.5, %v600_v26 }
  0x42   : > { %v329_v33 = vmul.f32 0.5, %v602_v28  ;;  %v604_v35 = vpop.eup %603 }
  0x43   : > { %v301_v36 = vadd.f32 0.5, %v299_v29  ;;  %v300_v41 = vmul.f32 0.5, %v604_v35  ;;  %v606_v43 = vpop.eup %605 }
  0x44   : > { %v331_v39 = vadd.f32 0.5, %v329_v33  ;;  %v330_v50 = vmul.f32 0.5, %v606_v43 }
  0x45   : > { %v305_v44 = vmul.f32 %v303_v30, %v301_v36  ;;  %v302_v49 = vadd.f32 0.5, %v300_v41 }
  0x46   : > { %v335_v48 = vmul.f32 %v333_v34, %v331_v39  ;;  %v332_v57 = vadd.f32 0.5, %v330_v50 }
  0x47   : > { %v311_v52 = vadd.f32 %v309_v37, %v305_v44  ;;  %v306_v56 = vmul.f32 %v304_v38, %v302_v49 }
  0x48   : > { %v341_v55 = vadd.f32 %v339_v40, %v335_v48  ;;  %v336_v62 = vmul.f32 %v334_v51, %v332_v57 }
  0x49   : > { %v315_v59 = vadd.f32 %v313_v45, %v311_v52  ;;  %v312_v61 = vadd.f32 %v310_v47, %v306_v56 }
  0x4a   : > { %v345_v60 = vadd.f32 %v343_v46, %v341_v55  ;;  %v342_v3 = vadd.f32 %v340_v58, %v336_v62 }
  0x4b   : > { %v347_v0 = vsub.f32 %v281_v54, %v315_v59  ;;  %v316_v2 = vadd.f32 %v314_v53, %v312_v61 }
  0x4c   : > { %v346_v5 = vadd.f32 %v344_v63, %v342_v3 }
  0x4d   : > { %v349_v4 = vmul.f32 %v347_v0, %v345_v60  ;;  %v348_v6 = vsub.f32 %v282_v1, %v316_v2 }
  0x4f   : > { %v351_v7 = vadd.f32 %v349_v4, %v315_v59  ;;  %v350_v8 = vmul.f32 %v348_v6, %v346_v5 }
  0x51   : > { %353 = vst [vmem:[%s274_s15] sm:$0xff] %v351_v7  ;;  %v352_v9 = vadd.f32 %v350_v8, %v316_v2 }
  0x53   : > { %354 = vst [vmem:[%s274_s15 + $0x8] sm:$0xff] %v352_v9 }
  0x54   : > { %724 = shalt.err (!%p721_p13)
}
  0x55   : > { %527 = dma.vmem_to_hbm [thread:$0]  (%p883_p4), %s372_s20, 256, %s374_s21, %s356_s23  }
  0x56 PF: > { %s385_s30 = sand.u32 1, %s767_s12   ;;  %p541_p0 = pnand %p499_p6, %p891_p7 }
  0x57   : > { %s386_s11 = scalar_lea.sflag [#allocation4], %s385_s30 }
  0x58   : > { %p542_p2 = pneg %p541_p0 }
  0x5a   : > { %762 = dma.done.wait (%p542_p2), %s386_s11, 256  }
  0x5b   : > { %764 = vsyncadd (%p542_p2), %s386_s11, 4294967040  ;;  %s22_s17 = sadd.s32 1, %s787_s17   ;;  %s1009_s2 = sld [smem:[#allocation15_spill]] }
  0x5c   : > { %p19_p5 = scmp.ge.s32.totalorder %s22_s17, 4   ;;  %s1010_s15 = sld [smem:[#allocation13_spill]] }
  0x5d   : > { %s1011_s16 = sld [smem:[#allocation14_spill]]  ;;  %s1012_s12 = smov %s771_s13 }
  0x5e   : > { %s1013_s13 = smov %s775_s14  ;;  %21 = sbr.rel (!%p19_p5) target bundleno = 10 (0xa), region = 95 }
  0x61   : > { %s1014_s14 = smov %s1009_s2 }
  0x63   :  { %392 = vsyncpa [#allocation3], 1 }
  0x64   :  { %394 = vsyncpa [#allocation3 + $0x1], 1 }
  0x65   :  { %395 = vsyncpa [#allocation6], 1 }
  0x66   :  { %397 = vsyncpa [#allocation6 + $0x1], 1 }
  0x67   :  { %398 = vsyncpa [#allocation4], 1 }
  0x68   :  { %400 = vsyncpa [#allocation4 + $0x1], 1 }

</bundles_post_ra>
